<compile_context>
chip_gen: v7x
topology: tpu7x:2x2x1
jax: 0.10.0
libtpu: 0.0.40
codegen_flags: <defaults>
</compile_context>

<pallas_src>
import jax
import jax.numpy as jnp
from jax.experimental import pallas as pl
from jax.experimental.pallas import tpu as pltpu


def _round_up(x, m):
    return (x + m - 1) // m * m


def mlp_kernel(x_ref, w1_ref, b1_ref, w2_ref, b2_ref, o_ref):
    # hidden = relu(x @ W1 + b1); accumulate in f32 on the MXU.
    h = jnp.dot(x_ref[...], w1_ref[...], preferred_element_type=jnp.float32)
    h = jnp.maximum(h + b1_ref[...], 0.0)
    # Second GEMM: N is lane-dense (padded to a 128 multiple) so this is a full
    # MXU pass and the output store is an unmasked vst. Only down-cast h when
    # the weights are narrower than f32 (bf16 MXU rate); for f32 weights keep
    # the f32 accumulator so the reference tolerance holds.
    if w2_ref.dtype != jnp.float32:
        h = h.astype(w2_ref.dtype)
    out = jnp.dot(h, w2_ref[...], preferred_element_type=jnp.float32)
    o_ref[...] = (out + b2_ref[...]).astype(o_ref.dtype)


def cnn_forward(x, w1, b1, w2, b2, *, tile_m=128):
    """Pallas implementation of CNN.forward: Linear -> ReLU -> Linear.

    Handles arbitrary batch (zero-pads to a tile multiple) and pads the hidden
    and output feature dims to lane-dense (128-multiple) widths, slicing the
    padding off the result.
    """
    B, F = x.shape
    Fw, H = w1.shape
    Hw, O = w2.shape
    assert F == Fw and H == Hw, "weight shapes inconsistent with x"

    dsize = jnp.dtype(x.dtype).itemsize

    # Lane-dense feature padding.
    H_pad = _round_up(H, 128)
    O_pad = _round_up(O, 128)

    # Sublane-aligned batch tiling (f32 packs 8 rows per sublane group).
    tile_m = max(8, _round_up(min(tile_m, _round_up(B, 8)), 8))
    B_pad = _round_up(B, tile_m)
    grid = (B_pad // tile_m,)

    # Zero-pad operands (zeros contribute nothing through matmul/ReLU).
    xp = x if B_pad == B else jnp.zeros((B_pad, F), x.dtype).at[:B, :].set(x)
    w1p = w1 if H_pad == H else jnp.zeros((F, H_pad), w1.dtype).at[:, :H].set(w1)
    b1p = jnp.zeros((1, H_pad), b1.dtype).at[:, :H].set(b1.reshape(1, H))
    w2p = jnp.zeros((H_pad, O_pad), w2.dtype).at[:H, :O].set(w2)
    b2p = jnp.zeros((1, O_pad), b2.dtype).at[:, :O].set(b2.reshape(1, O))

    # Per-step VMEM budget (double-buffered tiles + resident weights); keep it
    # well under v7x's ~32 MiB scoped default (64 MiB physical).
    vmem_bytes = (
        2 * tile_m * F * dsize            # x tile (double-buffered)
        + 2 * tile_m * O_pad * dsize      # out tile (double-buffered)
        + 2 * (F * H_pad + H_pad * O_pad) * dsize   # W1/W2 blocks
        + 2 * (H_pad + O_pad) * dsize     # biases
    )
    assert vmem_bytes < 24 * 1024 * 1024, (
        "tile_m too large for VMEM; shrink tile_m or add a K grid axis over F")
    # TODO(synk): if n_feature grows large (flattened conv features), add a K
    # grid axis over F with an f32 VMEM accumulator + pl.when init/finalize
    # instead of keeping the full (F, H_pad) W1 block resident.

    out = pl.pallas_call(
        mlp_kernel,
        out_shape=jax.ShapeDtypeStruct((B_pad, O_pad), x.dtype),
        grid_spec=pltpu.PrefetchScalarGridSpec(
            num_scalar_prefetch=0,
            grid=grid,
            in_specs=[
                pl.BlockSpec((tile_m, F), lambda i: (i, 0)),      # x tile
                pl.BlockSpec((F, H_pad), lambda i: (0, 0)),       # W1 (resident)
                pl.BlockSpec((1, H_pad), lambda i: (0, 0)),       # b1
                pl.BlockSpec((H_pad, O_pad), lambda i: (0, 0)),   # W2 (resident)
                pl.BlockSpec((1, O_pad), lambda i: (0, 0)),       # b2
            ],
            out_specs=pl.BlockSpec((tile_m, O_pad), lambda i: (i, 0)),
        ),
        compiler_params=pltpu.CompilerParams(
            dimension_semantics=("parallel",),
            vmem_limit_bytes=64 * 1024 * 1024,
        ),
    )(xp, w1p, b1p, w2p, b2p)

    return out[:B, :O]


def init_params(key, n_feature, n_hidden, n_output, dtype=jnp.float32):
    """Deterministic init mirroring torch.nn.Linear default U(-1/sqrt(fan_in), +)."""
    k1, k2, k3, k4 = jax.random.split(key, 4)
    bound1 = 1.0 / jnp.sqrt(n_feature)
    bound2 = 1.0 / jnp.sqrt(n_hidden)
    # stored as (in, out) == transpose of PyTorch's (out, in) weight
    w1 = jax.random.uniform(k1, (n_feature, n_hidden), dtype, -bound1, bound1)
    b1 = jax.random.uniform(k2, (1, n_hidden), dtype, -bound1, bound1)
    w2 = jax.random.uniform(k3, (n_hidden, n_output), dtype, -bound2, bound2)
    b2 = jax.random.uniform(k4, (1, n_output), dtype, -bound2, bound2)
    return w1, b1, w2, b2


if __name__ == "__main__":
    n_feature, n_hidden, n_output = 16, 32, 4

    key = jax.random.PRNGKey(0)
    kx, kp = jax.random.split(key)
    w1, b1, w2, b2 = init_params(kp, n_feature, n_hidden, n_output)

    def ref_fn(x):
        return jnp.maximum(x @ w1 + b1, 0.0) @ w2 + b2

    # Case 1: batch that tiles evenly -> 4 grid steps (pipelined, dual-TC on v7x).
    batch = 512
    x = jax.random.normal(kx, (batch, n_feature), jnp.float32)
    out = jax.block_until_ready(cnn_forward(x, w1, b1, w2, b2, tile_m=128))
    assert out.shape == (batch, n_output)
    assert jnp.allclose(out, ref_fn(x), atol=1e-5, rtol=1e-5)

    # Case 2: ragged small batch exercises the zero-padding path.
    x_small = jax.random.normal(kx, (37, n_feature), jnp.float32)
    out_small = jax.block_until_ready(cnn_forward(x_small, w1, b1, w2, b2, tile_m=128))
    assert out_small.shape == (37, n_output)
    assert jnp.allclose(out_small, ref_fn(x_small), atol=1e-5, rtol=1e-5)

    print("KERNEL_OK")
</pallas_src>

<mosaic_0001>
module attributes {stable_mosaic.version = 11 : i64} {
  func.func @mlp_kernel(%arg0: i32, %arg1: memref<128x16xf32, #tpu.memory_space<vmem>>, %arg2: memref<16x128xf32, #tpu.memory_space<vmem>>, %arg3: memref<1x128xf32, #tpu.memory_space<vmem>>, %arg4: memref<128x128xf32, #tpu.memory_space<vmem>>, %arg5: memref<1x128xf32, #tpu.memory_space<vmem>>, %arg6: memref<128x128xf32, #tpu.memory_space<vmem>>) attributes {dimension_semantics = [#tpu.dimension_semantics<parallel>], iteration_bounds = array<i64: 4>, scalar_prefetch = 0 : i64, scratch_operands = 0 : i64, tpu.core_type = #tpu.core_type<tc>, window_params = [{transform_indices = @transform_0, window_bounds = array<i64: 128, 16>}, {pipeline_mode = #tpu.pipeline_mode<synchronous>, transform_indices = @transform_1, window_bounds = array<i64: 16, 128>}, {pipeline_mode = #tpu.pipeline_mode<synchronous>, transform_indices = @transform_2, window_bounds = array<i64: 1, 128>}, {pipeline_mode = #tpu.pipeline_mode<synchronous>, transform_indices = @transform_3, window_bounds = array<i64: 128, 128>}, {pipeline_mode = #tpu.pipeline_mode<synchronous>, transform_indices = @transform_4, window_bounds = array<i64: 1, 128>}, {transform_indices = @transform_5, window_bounds = array<i64: 128, 128>}]} {
    %c0 = arith.constant 0 : index
    %c0_0 = arith.constant 0 : index
    %0 = vector.load %arg1[%c0, %c0_0] : memref<128x16xf32, #tpu.memory_space<vmem>>, vector<128x16xf32>
    %c0_1 = arith.constant 0 : index
    %c0_2 = arith.constant 0 : index
    %1 = vector.load %arg2[%c0_1, %c0_2] : memref<16x128xf32, #tpu.memory_space<vmem>>, vector<16x128xf32>
    %cst = arith.constant dense<0.000000e+00> : vector<128x128xf32>
    %2 = tpu.matmul %0, %1, %cst {dimension_numbers = #tpu.dot_dimension_numbers<[1], [0], [0], [1], [0, 0, 1, 1], [], []>} : vector<128x16xf32>, vector<16x128xf32>, vector<128x128xf32> -> vector<128x128xf32>
    %c0_3 = arith.constant 0 : index
    %c0_4 = arith.constant 0 : index
    %3 = vector.load %arg3[%c0_3, %c0_4] : memref<1x128xf32, #tpu.memory_space<vmem>>, vector<1x128xf32>
    %4 = vector.broadcast %3 : vector<1x128xf32> to vector<128x128xf32>
    %5 = arith.addf %2, %4 : vector<128x128xf32>
    %cst_5 = arith.constant 0.000000e+00 : f32
    %6 = vector.broadcast %cst_5 : f32 to vector<128x128xf32>
    %7 = arith.maximumf %5, %6 : vector<128x128xf32>
    %c0_6 = arith.constant 0 : index
    %c0_7 = arith.constant 0 : index
    %8 = vector.load %arg4[%c0_6, %c0_7] : memref<128x128xf32, #tpu.memory_space<vmem>>, vector<128x128xf32>
    %cst_8 = arith.constant dense<0.000000e+00> : vector<128x128xf32>
    %9 = tpu.matmul %7, %8, %cst_8 {dimension_numbers = #tpu.dot_dimension_numbers<[1], [0], [0], [1], [0, 0, 1, 1], [], []>} : vector<128x128xf32>, vector<128x128xf32>, vector<128x128xf32> -> vector<128x128xf32>
    %c0_9 = arith.constant 0 : index
    %c0_10 = arith.constant 0 : index
    %10 = vector.load %arg5[%c0_9, %c0_10] : memref<1x128xf32, #tpu.memory_space<vmem>>, vector<1x128xf32>
    %11 = vector.broadcast %10 : vector<1x128xf32> to vector<128x128xf32>
    %12 = arith.addf %9, %11 : vector<128x128xf32>
    %c0_11 = arith.constant 0 : index
    %c0_12 = arith.constant 0 : index
    %13 = vector.load %arg6[%c0_11, %c0_12] : memref<128x128xf32, #tpu.memory_space<vmem>>, vector<128x128xf32>
    tpu.vector_store %arg6[%c0_11, %c0_12], %12 {strides = array<i32>} : memref<128x128xf32, #tpu.memory_space<vmem>>, vector<128x128xf32>,
    return
  }
  func.func @transform_0(%arg0: i32) -> (i32, i32) {
    %c0_i32 = arith.constant 0 : i32
    %c0_i32_0 = arith.constant 0 : i32
    return %arg0, %c0_i32 : i32, i32
  }
  func.func @transform_1(%arg0: i32) -> (i32, i32) {
    %c0_i32 = arith.constant 0 : i32
    %c0_i32_0 = arith.constant 0 : i32
    %c0_i32_1 = arith.constant 0 : i32
    return %c0_i32, %c0_i32_0 : i32, i32
  }
  func.func @transform_2(%arg0: i32) -> (i32, i32) {
    %c0_i32 = arith.constant 0 : i32
    %c0_i32_0 = arith.constant 0 : i32
    %c0_i32_1 = arith.constant 0 : i32
    return %c0_i32, %c0_i32_0 : i32, i32
  }
  func.func @transform_3(%arg0: i32) -> (i32, i32) {
    %c0_i32 = arith.constant 0 : i32
    %c0_i32_0 = arith.constant 0 : i32
    %c0_i32_1 = arith.constant 0 : i32
    return %c0_i32, %c0_i32_0 : i32, i32
  }
  func.func @transform_4(%arg0: i32) -> (i32, i32) {
    %c0_i32 = arith.constant 0 : i32
    %c0_i32_0 = arith.constant 0 : i32
    %c0_i32_1 = arith.constant 0 : i32
    return %c0_i32, %c0_i32_0 : i32, i32
  }
  func.func @transform_5(%arg0: i32) -> (i32, i32) {
    %c0_i32 = arith.constant 0 : i32
    %c0_i32_0 = arith.constant 0 : i32
    return %arg0, %c0_i32 : i32, i32
  }
}

</mosaic_0001>

<bundles_post_ra>
// kernel: tpu_custom_call.1
= control target key start
LH: loop header
LB: loop body
LE: loop exit
PB: predicated region body
PF: predicated region fallthrough
CT: control target
= control target key end

     0   :  { %10 = vsyncpa [#allocation3], 0  ;;  %s1761_s0 = inlined_call_operand.hbm [shape: f32[512,16], index: 0, kind: input, shape index: {}]   ;;  %s1762_s1 = inlined_call_operand.hbm [shape: f32[16,128], index: 1, kind: input, shape index: {}]   ;;  %s1763_s2 = inlined_call_operand.hbm [shape: f32[1,128], index: 2, kind: input, shape index: {}]   ;;  %s1764_s3 = inlined_call_operand.hbm [shape: f32[128,128], index: 3, kind: input, shape index: {}]   ;;  %s1765_s4 = inlined_call_operand.hbm [shape: f32[1,128], index: 4, kind: input, shape index: {}]   ;;  %s1766_s5 = inlined_call_operand.hbm [shape: f32[512,128], index: 5, kind: output, shape index: {}]  }
   0x1   :  { %12 = vsyncpa [#allocation3 + $0x1], 0 }
   0x2   :  { %13 = vsyncpa [#allocation6], 0 }
   0x3   :  { %14 = vsyncpa [#allocation9], 0 }
   0x4   :  { %15 = vsyncpa [#allocation4], 0 }
   0x5   :  { %17 = vsyncpa [#allocation4 + $0x1], 0  ;;  %s1420_s18 = smov 0   ;;  %s1422_s19 = smov 0  }
   0x6   :  { %s1424_s20 = smov 0   ;;  %s1426_s21 = smov 0  }
   0x7 LB: > { %s1441_s22 = sadd.s32 4294967295, %s1378_s21   ;;  %s843_s23 = sadd.s32 4294967294, %s1378_s21   ;;  %s1378_s21 = sphi %s1426_s21, %s1788_s21   ;;  %s1374_s20 = sphi %s1424_s20, %s1787_s20   ;;  %s1370_s19 = sphi %s1422_s19, %s1786_s19   ;;  %s1366_s18 = sphi %s1420_s18, %s1785_s18  }
   0x8   : > { %p43_p0 = scmp.ne.s32.totalorder %s1370_s19, %s1366_s18  ;;  %p1767_p1 = scmp.eq.s32.totalorder %s1441_s22, 0 }
   0x9   : > { %p157_p3 = scmp.eq.s32.totalorder %s843_s23, 3  ;;  %p844_p5 = scmp.ge.s32.totalorder %s1378_s21, 1 }
   0xa   : > { %p1450_p4 = por %p1767_p1, %p43_p0  ;;  %p164_p7 = scmp.lt.s32.totalorder %s1378_s21, 5 }
   0xb   : > { %p1455_p6 = por %p157_p3, %p43_p0  ;;  %s1380_s27 = smov [#allocation5]  }
   0xc   : > { %s1770_s24 = scalar_select %p1450_p4, 1, 0 }
   0xd   : > { %s1771_s25 = scalar_select %p1455_p6, 1, 0 }
   0xe   : > { %p1460_p8 = pnand %p844_p5, %p164_p7  ;;  %s176_s28 = sshll.u32 %s1380_s27, 4  ;;  %s1464_s28 = int_to_ptr.vmem [resolvable:$true] %s176_s28 }
   0xf   : > { %s1381_s30 = smov [#allocation8]   ;;  %s1382_s7 = smov [#allocation7]  }
  0x10   : > { %s1772_s26 = scalar_select %p1460_p8, 1, 0 }
  0x11   : > { %p1091_p9 = pneg %p1460_p8  ;;  %s200_s6 = sshll.u32 %s1381_s30, 4  ;;  %s1474_s6 = int_to_ptr.vmem [resolvable:$true] %s200_s6 }
  0x12   : > { %s1476_s8 = sshll.u32 %s1382_s7, 4  ;;  %s1162_s11 = scalar_lea.hbm %s1762_s1, 256  ;;  %s191_s8 = int_to_ptr.vmem [resolvable:$true] %s1476_s8 }
  0x13   : > { %p1470_p10 = pnand %p1091_p9, %p1767_p1  ;;  %p1163_p11 = scmp.ne.s32.totalorder %s1762_s1, %s1162_s11 }
  0x14   : > { %p1169_p3 = scmp.lt.u32.totalorder %s1162_s11, %s1762_s1 }
  0x15   : > { %p1486_p12 = pneg %p1470_p10 }
  0x17   : > { %p1165_p13 = pnand %p1486_p12, %p1163_p11 }
  0x19   : > { %p1166_p0 = pneg %p1165_p13 }
  0x1b   : > { %p1171_p5 = pnand %p1169_p3, %p1166_p0 }
  0x1d   : > { %1174 = shalt.err (!%p1171_p5)
}
  0x1e   : > { %s1175_s17 = scalar_lea.vmem %s1464_s28, 256  ;;  %p1183_p2 = scmp.lt.s32.totalorder %s1464_s28, %s1464_s28 }
  0x1f   : > { %p1176_p7 = scmp.ne.s32.totalorder %s1464_s28, %s1175_s17  ;;  %p1184_p6 = scmp.lt.s32.totalorder %s1175_s17, %s1175_s17 }
  0x21   : > { %p1178_p9 = pnand %p1176_p7, %p1486_p12  ;;  %p1185_p11 = por %p1184_p6, %p1183_p2 }
  0x23   : > { %p1179_p1 = pneg %p1178_p9 }
  0x25   : > { %p1186_p13 = pnand %p1185_p11, %p1179_p1 }
  0x27   : > { %1189 = shalt.err (!%p1186_p13)
}
  0x28   : > { %s1383_s23 = smov 128   ;;  %s1384_s27 = smov 8  }
  0x29   : > { %1094 = dma.hbm_to_vmem [thread:$0]  (!%p1470_p10), %s1762_s1, 256, %s1464_s28, [#allocation6], %s1383_s23, %s1383_s23, %s1384_s27  }
  0x2a   : > { %s1190_s11 = scalar_lea.hbm %s1764_s3, 2048 }
  0x2b   : > { %p1191_p1 = scmp.ne.s32.totalorder %s1764_s3, %s1190_s11  ;;  %p1197_p0 = scmp.lt.u32.totalorder %s1190_s11, %s1764_s3 }
  0x2d   : > { %p1193_p2 = pnand %p1191_p1, %p1486_p12 }
  0x2f   : > { %p1194_p6 = pneg %p1193_p2 }
  0x31   : > { %p1199_p3 = pnand %p1197_p0, %p1194_p6 }
  0x33   : > { %1202 = shalt.err (!%p1199_p3)
}
  0x34   : > { %s1203_s28 = scalar_lea.vmem %s1474_s6, 2048  ;;  %p1211_p11 = scmp.lt.s32.totalorder %s1474_s6, %s1474_s6 }
  0x35   : > { %p1204_p5 = scmp.ne.s32.totalorder %s1474_s6, %s1203_s28  ;;  %p1212_p13 = scmp.lt.s32.totalorder %s1203_s28, %s1203_s28 }
  0x37   : > { %p1206_p7 = pnand %p1204_p5, %p1486_p12  ;;  %p1213_p1 = por %p1212_p13, %p1211_p11 }
  0x39   : > { %p1207_p9 = pneg %p1206_p7 }
  0x3b   : > { %p1214_p2 = pnand %p1213_p1, %p1207_p9 }
  0x3d   : > { %1217 = shalt.err (!%p1214_p2)
}
  0x3e   : > { %1100 = dma.hbm_to_vmem [thread:$0]  (!%p1470_p10), %s1764_s3, 2048, %s1474_s6, [#allocation9], %s1383_s23, %s1383_s23, %s1384_s27  }
  0x3f   : > { %s1218_s10 = scalar_lea.hbm %s1763_s2, 16 }
  0x40   : > { %p1219_p6 = scmp.ne.s32.totalorder %s1763_s2, %s1218_s10  ;;  %p1225_p5 = scmp.lt.u32.totalorder %s1218_s10, %s1763_s2 }
  0x42   : > { %p1221_p0 = pnand %p1219_p6, %p1486_p12 }
  0x44   : > { %p1222_p3 = pneg %p1221_p0 }
  0x46   : > { %p1227_p7 = pnand %p1225_p5, %p1222_p3 }
  0x48   : > { %1230 = shalt.err (!%p1227_p7)
}
  0x49   : > { %s1231_s16 = scalar_lea.vmem %s191_s8, 16  ;;  %s1238_s6 = scalar_lea.vmem %s191_s8, 32 }
  0x4a   : > { %p1232_p9 = scmp.ne.s32.totalorder %s191_s8, %s1231_s16  ;;  %p1239_p1 = scmp.lt.s32.totalorder %s191_s8, %s191_s8 }
  0x4b   : > { %p1240_p2 = scmp.lt.s32.totalorder %s1238_s6, %s1231_s16 }
  0x4c   : > { %p1234_p11 = pnand %p1232_p9, %p1486_p12 }
  0x4d   : > { %p1241_p4 = por %p1240_p2, %p1239_p1 }
  0x4e   : > { %p1235_p13 = pneg %p1234_p11 }
  0x50   : > { %p1242_p8 = pnand %p1241_p4, %p1235_p13 }
  0x52   : > { %1245 = shalt.err (!%p1242_p8)
}
  0x53   : > { %1097 = dma.hbm_to_vmem [thread:$0]  (!%p1470_p10), %s1763_s2, 16, %s191_s8, [#allocation6]  }
  0x54   : > { %s1385_s30 = smov [#allocation10]   ;;  %s1246_s11 = scalar_lea.hbm %s1765_s4, 16 }
  0x55   : > { %s214_s7 = sshll.u32 %s1385_s30, 4  ;;  %p1247_p6 = scmp.ne.s32.totalorder %s1765_s4, %s1246_s11  ;;  %s215_s7 = int_to_ptr.vmem [resolvable:$true] %s214_s7 }
  0x56   : > { %p1253_p0 = scmp.lt.u32.totalorder %s1246_s11, %s1765_s4 }
  0x57   : > { %p1249_p4 = pnand %p1247_p6, %p1486_p12 }
  0x59   : > { %p1250_p8 = pneg %p1249_p4 }
  0x5b   : > { %p1255_p3 = pnand %p1253_p0, %p1250_p8 }
  0x5d   : > { %1258 = shalt.err (!%p1255_p3)
}
  0x5e   : > { %s1259_s8 = scalar_lea.vmem %s215_s7, 16  ;;  %s1266_s6 = scalar_lea.vmem %s215_s7, 32 }
  0x5f   : > { %p1260_p5 = scmp.ne.s32.totalorder %s215_s7, %s1259_s8  ;;  %p1267_p11 = scmp.lt.s32.totalorder %s215_s7, %s215_s7 }
  0x60   : > { %p1268_p13 = scmp.lt.s32.totalorder %s1266_s6, %s1259_s8 }
  0x61   : > { %p1262_p7 = pnand %p1260_p5, %p1486_p12 }
  0x62   : > { %p1269_p1 = por %p1268_p13, %p1267_p11 }
  0x63   : > { %p1263_p9 = pneg %p1262_p7 }
  0x65   : > { %p1270_p2 = pnand %p1269_p1, %p1263_p9 }
  0x67   : > { %1273 = shalt.err (!%p1270_p2)
}
  0x68   : > { %1103 = dma.hbm_to_vmem [thread:$0]  (!%p1470_p10), %s1765_s4, 16, %s215_s7, [#allocation9]  }
  0x69   : > { %s1574_s14 = sadd.s32 1, %s1378_s21   ;;  %s30_s30 = sadd.s32 1, %s1374_s20 }
  0x6a   : > { %s27_s29 = ssub.s32 %s1378_s21, %s1574_s14  ;;  %p37_p12 = scmp.ne.s32.totalorder %s1374_s20, %s1370_s19 }
  0x6b   : > { %p28_p6 = scmp.eq.s32.totalorder %s27_s29, 0  ;;  %p38_p4 = scmp.eq.s32.totalorder %s1378_s21, 0 }
  0x6c   : > { %p1775_p8 = scmp.eq.s32.totalorder %s1441_s22, 3  ;;  %p1116_p3 = scmp.lt.s32.totalorder %s1378_s21, 4 }
  0x6d   : > { %s1590_s10 = scalar_select %p28_p6, %s1374_s20, %s30_s30  }
  0x6e   : > { %p1584_p0 = por %p1775_p8, %p37_p12  ;;  %p39_p5 = por %p38_p4, %p37_p12 }
  0x6f   : > { %s225_s11 = sand.u32 1, %s1374_s20   ;;  %s883_s7 = sshll.u32 %s1378_s21, 11 }
  0x70   : > { %s850_s12 = sshll.u32 %s225_s11, 7  ;;  %s1597_s16 = scalar_lea.hbm %s1761_s0, %s883_s7 }
  0x71   : > { %s229_s8 = scalar_lea.vmem [#allocation2], %s850_s12  ;;  %p1601_p10 = pnand %p1116_p3, %p39_p5 }
  0x72   : > { %s236_s6 = sshll.u32 %s229_s8, 4  ;;  %s1605_s17 = scalar_lea.sflag [#allocation3], %s225_s11  ;;  %s1599_s6 = int_to_ptr.vmem [resolvable:$true] %s236_s6 }
  0x73   : > { %s1274_s30 = scalar_lea.hbm %s1597_s16, 2048  ;;  %p1276_p9 = pneg %p1601_p10 }
  0x74   : > { %p1275_p7 = scmp.ne.s32.totalorder %s1597_s16, %s1274_s30  ;;  %s1279_s7 = scalar_lea.hbm %s1761_s0, 8192 }
  0x75   : > { %p1280_p1 = scmp.lt.u32.totalorder %s1597_s16, %s1761_s0  ;;  %p1281_p2 = scmp.lt.u32.totalorder %s1279_s7, %s1274_s30 }
  0x76   : > { %p1277_p11 = pnand %p1276_p9, %p1275_p7  ;;  %p1283_p6 = scmp.lt.u32.totalorder %s1274_s30, %s1597_s16 }
  0x77   : > { %p1282_p12 = por %p1281_p2, %p1280_p1 }
  0x78   : > { %p1278_p13 = pneg %p1277_p11 }
  0x79   : > { %p1284_p4 = por %p1283_p6, %p1282_p12 }
  0x7b   : > { %p1285_p8 = pnand %p1284_p4, %p1278_p13 }
  0x7d   : > { %1288 = shalt.err (!%p1285_p8)
}
  0x7e   : > { %s1289_s11 = scalar_lea.vmem %s1599_s6, 2048  ;;  %s1386_s8 = smov [#allocation2]  }
  0x7f   : > { %p1290_p3 = scmp.ne.s32.totalorder %s1599_s6, %s1289_s11  ;;  %s1294_s29 = sshll.u32 %s1386_s8, 4  ;;  %s1295_s29 = int_to_ptr.vmem [resolvable:$false] %s1294_s29 }
  0x80   : > { %s1296_s12 = scalar_lea.vmem %s1295_s29, 4096  ;;  %p1297_p11 = scmp.lt.s32.totalorder %s1599_s6, %s1295_s29 }
  0x81   : > { %p1292_p5 = pnand %p1290_p3, %p1276_p9  ;;  %p1298_p1 = scmp.lt.s32.totalorder %s1296_s12, %s1289_s11 }
  0x83   : > { %p1293_p7 = pneg %p1292_p5  ;;  %p1299_p2 = por %p1298_p1, %p1297_p11 }
  0x85   : > { %p1300_p12 = pnand %p1299_p2, %p1293_p7 }
  0x87   : > { %1303 = shalt.err (!%p1300_p12)
}
  0x88   : > { %1107 = dma.hbm_to_vmem [thread:$0]  (!%p1601_p10), %s1597_s16, 2048, %s1599_s6, %s1605_s17, %s1383_s23, %s1383_s23, %s1384_s27  }
  0x89   : > { %p1778_p9 = scmp.ne.s32.totalorder %s1772_s26, 0 }
  0x8a   : > { %s1639_s30 = sand.u32 (!%p1778_p9), 1, %s1370_s19   ;;  %p1779_p13 = scmp.ne.s32.totalorder (!%p1778_p9), %s1770_s24, 0 }
  0x8b   : > { %248 = sbr.rel (%p1778_p9) target bundleno = 637 (0x27d), region = 40  ;;  %s854_s7 = sshll.u32 (!%p1778_p9), %s1639_s30, 7 }
  0x8c   : > { %s251_s13 = scalar_lea.sflag (!%p1778_p9), [#allocation3], %s1639_s30  ;;  %s1645_s28 = scalar_lea.vmem (!%p1778_p9), [#allocation2], %s854_s7 }
  0x92   : > { %1349 = dma.done.wait (%p1779_p13), %s251_s13, 2048  }
  0x93   : > { %1351 = vsyncadd (%p1779_p13), %s251_s13, 4294965248  ;;  %p1780_p10 = scmp.eq.s32.totalorder %s1441_s22, 0 }
  0x95   : > { %1353 = dma.done.wait (%p1780_p10), [#allocation6], 272   ;;  %p1781_p6 = pmov %p1780_p10 }
  0x97   : > { %1355 = vsyncadd (%p1781_p6), [#allocation6], 4294967024  ;;  %p1782_p4 = pmov %p1781_p6 }
  0x99   : > { %1357 = dma.done.wait (%p1782_p4), [#allocation9], 2064   ;;  %p1783_p8 = pmov %p1782_p4 }
  0x9a   : > { %vm324_vm0 = vcmask 130048   ;;  %v315_v0 = vld [vmem:[#allocation5] sm:$0xff]  ;;  %v316_v1 = vld [vmem:[#allocation5 + $0x8] sm:$0xff]  ;;  %v301_v5 = vld [vmem:[%s1645_s28 + $0x10] sm:$0xff]  ;;  %s1693_s24 = scalar_lea.vmem [#allocation11], %s854_s7  ;;  %s884_s26 = sshll.u32 %s1441_s22, 11 }
  0x9b   : > { %1359 = vsyncadd (%p1783_p8), [#allocation9], 4294965232  ;;  %v299_v2 = vld [vmem:[%s1645_s28] sm:$0xff]  ;;  %v1019_v3 = vpack.c.bf16 %v316_v1, %v315_v0  ;;  %v300_v4 = vld [vmem:[%s1645_s28 + $0x8] sm:$0xff]  ;;  %s732_s23 = sshll.u32 %s1693_s24, 4  ;;  %s1714_s6 = scalar_lea.hbm %s1766_s5, %s884_s26  ;;  %s1716_s23 = int_to_ptr.vmem [resolvable:$true] %s732_s23 }
  0x9c   : > { %939 = vmatprep.mubr.msk.f32.mxu0 %vm324_vm0, %v299_v2  ;;  %v534_v6 = vld [vmem:[#allocation8] sm:$0xff]  ;;  %v535_v7 = vld [vmem:[#allocation8 + $0x8] sm:$0xff]  ;;  %v536_v8 = vld [vmem:[#allocation8 + $0x10] sm:$0xff]  ;;  %s719_s22 = scalar_lea.sflag [#allocation4], %s1639_s30  ;;  %s1304_s17 = scalar_lea.vmem %s1716_s23, 2048 }
  0x9d   : > { %1020 = vmatprep.subr.bf16.mxu0 %v1019_v3  ;;  %v1023_v9 = vpack.c.bf16 %v535_v7, %v534_v6  ;;  %v537_v10 = vld [vmem:[#allocation8 + $0x18] sm:$0xff]  ;;  %v302_v11 = vld [vmem:[%s1645_s28 + $0x18] sm:$0xff]  ;;  %v303_v15 = vld [vmem:[%s1645_s28 + $0x20] sm:$0xff]  ;;  %p1305_p3 = scmp.ne.s32.totalorder %s1716_s23, %s1304_s17  ;;  %s1387_s15 = smov [#allocation11]  }
  0x9e   : > { %1022 = vmatpush3.bf16.msra.mxu0 %v1019_v3  ;;  %v1027_v12 = vpack.c.bf16 %v537_v10, %v536_v8  ;;  %v538_v13 = vld [vmem:[#allocation8 + $0x20] sm:$0xff]  ;;  %v539_v14 = vld [vmem:[#allocation8 + $0x28] sm:$0xff]  ;;  %v304_v17 = vld [vmem:[%s1645_s28 + $0x28] sm:$0xff]  ;;  %s1308_s11 = sshll.u32 %s1387_s15, 4  ;;  %s1309_s11 = int_to_ptr.vmem [resolvable:$false] %s1308_s11 }
  0x9f   : > { %1024 = vmatprep.subr.bf16.mxu0 %v1023_v9  ;;  %1055 = vmatprep.subr.bf16.mxu1 %v1023_v9  ;;  %v1031_v16 = vpack.c.bf16 %v539_v14, %v538_v13  ;;  %v540_v18 = vld [vmem:[#allocation8 + $0x30] sm:$0xff]  ;;  %v541_v19 = vld [vmem:[#allocation8 + $0x38] sm:$0xff]  ;;  %v306_v22 = vld [vmem:[%s1645_s28 + $0x38] sm:$0xff]  ;;  %p1306_p5 = pnand %p1305_p3, %p1584_p0  ;;  %s1310_s8 = scalar_lea.vmem %s1309_s11, 4096 }
  0xa0   : > { %1063 = vmatpush3.bf16.msra.mxu1 %v1023_v9  ;;  %v305_v20 = vld [vmem:[%s1645_s28 + $0x30] sm:$0xff]  ;;  %v1035_v21 = vpack.c.bf16 %v541_v19, %v540_v18  ;;  %v543_v24 = vld [vmem:[#allocation8 + $0x48] sm:$0xff]  ;;  %v308_v27 = vld [vmem:[%s1645_s28 + $0x48] sm:$0xff]  ;;  %p1311_p11 = scmp.lt.s32.totalorder %s1716_s23, %s1309_s11  ;;  %p1312_p1 = scmp.lt.s32.totalorder %s1310_s8, %s1304_s17 }
  0xa1   : > { %940 = vmatmul.mubr.msk.f32.vlgmr.msra.gmra.mrb[0].mxu0 %vm324_vm0, %v300_v4  ;;  %1056 = vmatprep.subr.bf16.mxu1 %v1027_v12  ;;  %v542_v23 = vld [vmem:[#allocation8 + $0x40] sm:$0xff]  ;;  %v307_v25 = vld [vmem:[%s1645_s28 + $0x40] sm:$0xff]  ;;  %v545_v29 = vld [vmem:[#allocation8 + $0x58] sm:$0xff]  ;;  %p1307_p7 = pneg %p1306_p5 }
  0xa2   : > { %942 = vmatprep.mubr.msk.f32.mxu0 %vm324_vm0, %v301_v5  ;;  %1026 = vmatpush3.bf16.msra.mxu0 %v1023_v9  ;;  %v1039_v26 = vpack.c.bf16 %v543_v24, %v542_v23  ;;  %v544_v28 = vld [vmem:[#allocation8 + $0x50] sm:$0xff]  ;;  %v309_v30 = vld [vmem:[%s1645_s28 + $0x50] sm:$0xff]  ;;  %v310_v32 = vld [vmem:[%s1645_s28 + $0x58] sm:$0xff]  ;;  %p1313_p2 = por %p1312_p1, %p1311_p11 }
  0xa3   : > { %1028 = vmatprep.subr.bf16.mxu0 %v1027_v12  ;;  %v1043_v31 = vpack.c.bf16 %v545_v29, %v544_v28  ;;  %v546_v33 = vld [vmem:[#allocation8 + $0x60] sm:$0xff]  ;;  %v547_v34 = vld [vmem:[#allocation8 + $0x68] sm:$0xff]  ;;  %v312_v37 = vld [vmem:[%s1645_s28 + $0x68] sm:$0xff] }
  0xa4   : > { %1064 = vmatpush3.bf16.msra.mxu1 %v1027_v12  ;;  %v311_v35 = vld [vmem:[%s1645_s28 + $0x60] sm:$0xff]  ;;  %v1047_v36 = vpack.c.bf16 %v547_v34, %v546_v33  ;;  %v313_v38 = vld [vmem:[%s1645_s28 + $0x70] sm:$0xff]  ;;  %v314_v39 = vld [vmem:[%s1645_s28 + $0x78] sm:$0xff]  ;;  %p1314_p12 = pnand %p1313_p2, %p1307_p7 }
  0xa5   : > { %943 = vmatmul.mubr.msk.f32.gmra.mrb[2].mxu0 %vm324_vm0, %v302_v11  ;;  %1057 = vmatprep.subr.bf16.mxu1 %v1031_v16  ;;  %v548_v40 = vld [vmem:[#allocation8 + $0x70] sm:$0xff]  ;;  %v549_v41 = vld [vmem:[#allocation8 + $0x78] sm:$0xff]  ;;  %v877_v28 = vld [vmem:[#allocation10] ss:$0 sm:$0xff] }
  0xa6   : > { %945 = vmatprep.mubr.msk.f32.mxu0 %vm324_vm0, %v303_v15  ;;  %1030 = vmatpush3.bf16.msra.mxu0 %v1027_v12  ;;  %v1051_v42 = vpack.c.bf16 %v549_v41, %v548_v40  ;;  %v860_v43 = vld [vmem:[#allocation7] ss:$0 sm:$0xff] }
  0xa7   : > { %1032 = vmatprep.subr.bf16.mxu0 %v1031_v16 }
  0xa8   : > { %1065 = vmatpush3.bf16.msra.mxu1 %v1031_v16 }
  0xa9   : > { %946 = vmatmul.mubr.msk.f32.gmra.mrb[4].mxu0 %vm324_vm0, %v304_v17  ;;  %1058 = vmatprep.subr.bf16.mxu1 %v1035_v21 }
  0xaa   : > { %948 = vmatprep.mubr.msk.f32.mxu0 %vm324_vm0, %v305_v20  ;;  %1034 = vmatpush3.bf16.msra.mxu0 %v1031_v16 }
  0xab   : > { %1036 = vmatprep.subr.bf16.mxu0 %v1035_v21 }
  0xac   : > { %1066 = vmatpush3.bf16.msra.mxu1 %v1035_v21 }
  0xad   : > { %949 = vmatmul.mubr.msk.f32.gmra.mrb[6].mxu0 %vm324_vm0, %v306_v22  ;;  %1059 = vmatprep.subr.bf16.mxu1 %v1039_v26 }
  0xae   : > { %951 = vmatprep.mubr.msk.f32.mxu0 %vm324_vm0, %v307_v25  ;;  %1038 = vmatpush3.bf16.msra.mxu0 %v1035_v21 }
  0xaf   : > { %1040 = vmatprep.subr.bf16.mxu0 %v1039_v26 }
  0xb0   : > { %1067 = vmatpush3.bf16.msra.mxu1 %v1039_v26 }
  0xb1   : > { %952 = vmatmul.mubr.msk.f32.gmra.mrb[8].mxu0 %vm324_vm0, %v308_v27  ;;  %1060 = vmatprep.subr.bf16.mxu1 %v1043_v31 }
  0xb2   : > { %954 = vmatprep.mubr.msk.f32.mxu0 %vm324_vm0, %v309_v30  ;;  %1042 = vmatpush3.bf16.msra.mxu0 %v1039_v26 }
  0xb3   : > { %1044 = vmatprep.subr.bf16.mxu0 %v1043_v31 }
  0xb4   : > { %1068 = vmatpush3.bf16.msra.mxu1 %v1043_v31 }
  0xb5   : > { %955 = vmatmul.mubr.msk.f32.gmra.mrb[10].mxu0 %vm324_vm0, %v310_v32  ;;  %1061 = vmatprep.subr.bf16.mxu1 %v1047_v36 }
  0xb6   : > { %957 = vmatprep.mubr.msk.f32.mxu0 %vm324_vm0, %v311_v35  ;;  %1046 = vmatpush3.bf16.msra.mxu0 %v1043_v31 }
  0xb7   : > { %1048 = vmatprep.subr.bf16.mxu0 %v1047_v36 }
  0xb8   : > { %1069 = vmatpush3.bf16.msra.mxu1 %v1047_v36 }
  0xb9   : > { %958 = vmatmul.mubr.msk.f32.gmra.mrb[12].mxu0 %vm324_vm0, %v312_v37  ;;  %1062 = vmatprep.subr.bf16.mxu1 %v1051_v42 }
  0xba   : > { %960 = vmatprep.mubr.msk.f32.mxu0 %vm324_vm0, %v313_v38  ;;  %1050 = vmatpush3.bf16.msra.mxu0 %v1047_v36 }
  0xbb   : > { %1052 = vmatprep.subr.bf16.mxu0 %v1051_v42 }
  0xbc   : > { %1070 = vmatpush3.bf16.msra.mxu1 %v1051_v42 }
  0xbd   : > { %961 = vmatmul.mubr.msk.f32.gmra.mrb[14].mxu0 %vm324_vm0, %v314_v39 }
  0xbe   : > { %1054 = vmatpush3.bf16.msra.mxu0 %v1051_v42 }
 0x174   : > { %v941_v44 = vpop.f32.mrb[0].mxu0 }
 0x175   : > { %v445_v45 = vadd.f32 %v941_v44, %v860_v43  ;;  %v439_v46 = vpop.f32.mrb[1].mxu0 }
 0x176   : > { %v440_v47 = vadd.f32 %v860_v43, %v439_v46 }
 0x177   : > { %v519_v50 = vmax.f32 %v445_v45, 0.0 }
 0x178   : > { %v518_v48 = vmax.f32 %v440_v47, 0.0  ;;  %v944_v49 = vpop.f32.mrb[2].mxu0 }
 0x179   : > { %v455_v51 = vadd.f32 %v944_v49, %v860_v43  ;;  %v449_v52 = vpop.f32.mrb[3].mxu0 }
 0x17a   : > { %v450_v53 = vadd.f32 %v860_v43, %v449_v52  ;;  %995 = vmatprep.mubr.f32.mxu0 %v518_v48 }
 0x17b   : > { %996 = vmatmul.mubr.f32.vlgmr.msra.gmra.mrb[16].mxu0 %v519_v50  ;;  %v521_v56 = vmax.f32 %v455_v51, 0.0 }
 0x17c   : > { %v520_v54 = vmax.f32 %v450_v53, 0.0  ;;  %v947_v55 = vpop.f32.mrb[4].mxu0 }
 0x17d   : > { %v465_v57 = vadd.f32 %v947_v55, %v860_v43  ;;  %v459_v58 = vpop.f32.mrb[5].mxu0 }
 0x17e   : > { %v460_v59 = vadd.f32 %v860_v43, %v459_v58  ;;  %998 = vmatprep.mubr.f32.mxu0 %v520_v54 }
 0x17f   : > { %999 = vmatmul.mubr.f32.gmra.mrb[18].mxu0 %v521_v56  ;;  %v523_v62 = vmax.f32 %v465_v57, 0.0 }
 0x180   : > { %v522_v60 = vmax.f32 %v460_v59, 0.0  ;;  %v950_v61 = vpop.f32.mrb[6].mxu0 }
 0x181   : > { %v475_v63 = vadd.f32 %v950_v61, %v860_v43  ;;  %v469_v0 = vpop.f32.mrb[7].mxu0 }
 0x182   : > { %1001 = vmatprep.mubr.f32.mxu0 %v522_v60  ;;  %v470_v1 = vadd.f32 %v860_v43, %v469_v0 }
 0x183   : > { %1002 = vmatmul.mubr.f32.gmra.mrb[20].mxu0 %v523_v62  ;;  %v525_v4 = vmax.f32 %v475_v63, 0.0 }
 0x184   : > { %v953_v2 = vpop.f32.mrb[8].mxu0  ;;  %v524_v3 = vmax.f32 %v470_v1, 0.0 }
 0x185   : > { %v485_v5 = vadd.f32 %v953_v2, %v860_v43  ;;  %v479_v6 = vpop.f32.mrb[9].mxu0 }
 0x186   : > { %v480_v7 = vadd.f32 %v860_v43, %v479_v6  ;;  %1004 = vmatprep.mubr.f32.mxu1 %v524_v3 }
 0x187   : > { %1005 = vmatmul.mubr.f32.vlgmr.msra.gmra.mrb[0].mxu1 %v525_v4  ;;  %v527_v10 = vmax.f32 %v485_v5, 0.0 }
 0x188   : > { %v526_v8 = vmax.f32 %v480_v7, 0.0  ;;  %v956_v9 = vpop.f32.mrb[10].mxu0 }
 0x189   : > { %v495_v11 = vadd.f32 %v956_v9, %v860_v43  ;;  %v489_v12 = vpop.f32.mrb[11].mxu0 }
 0x18a   : > { %v490_v13 = vadd.f32 %v860_v43, %v489_v12  ;;  %1007 = vmatprep.mubr.f32.mxu1 %v526_v8 }
 0x18b   : > { %1008 = vmatmul.mubr.f32.gmra.mrb[2].mxu1 %v527_v10  ;;  %v529_v16 = vmax.f32 %v495_v11, 0.0 }
 0x18c   : > { %v528_v14 = vmax.f32 %v490_v13, 0.0  ;;  %v959_v15 = vpop.f32.mrb[12].mxu0 }
 0x18d   : > { %v505_v17 = vadd.f32 %v959_v15, %v860_v43  ;;  %v499_v18 = vpop.f32.mrb[13].mxu0 }
 0x18e   : > { %v500_v19 = vadd.f32 %v860_v43, %v499_v18  ;;  %1010 = vmatprep.mubr.f32.mxu1 %v528_v14 }
 0x18f   : > { %1011 = vmatmul.mubr.f32.gmra.mrb[4].mxu1 %v529_v16  ;;  %v531_v22 = vmax.f32 %v505_v17, 0.0 }
 0x190   : > { %v530_v20 = vmax.f32 %v500_v19, 0.0  ;;  %v962_v21 = vpop.f32.mrb[14].mxu0 }
 0x191   : > { %v515_v23 = vadd.f32 %v962_v21, %v860_v43  ;;  %v509_v24 = vpop.f32.mrb[15].mxu0 }
 0x192   : > { %v510_v25 = vadd.f32 %v860_v43, %v509_v24  ;;  %1013 = vmatprep.mubr.f32.mxu1 %v530_v20 }
 0x193   : > { %1014 = vmatmul.mubr.f32.gmra.mrb[6].mxu1 %v531_v22  ;;  %v533_v27 = vmax.f32 %v515_v23, 0.0 }
 0x194   : > { %v532_v26 = vmax.f32 %v510_v25, 0.0 }
 0x196   : > { %1016 = vmatprep.mubr.f32.mxu1 %v532_v26 }
 0x197   : > { %1017 = vmatmul.mubr.f32.gmra.mrb[8].mxu1 %v533_v27 }
 0x24e   : > { %v997_v29 = vpop.f32.mrb[16].mxu0 }
 0x24f   : > { %v629_v30 = vadd.f32 %v997_v29, %v877_v28  ;;  %v623_v31 = vpop.f32.mrb[17].mxu0 }
 0x250   : > { %v624_v32 = vadd.f32 %v877_v28, %v623_v31 }
 0x251   : > { %703 = vst [vmem:[%s1693_s24 + $0x8] sm:$0xff] %v629_v30 }
 0x252   : > { %702 = vst [vmem:[%s1693_s24] sm:$0xff] %v624_v32  ;;  %v1000_v33 = vpop.f32.mrb[18].mxu0 }
 0x253   : > { %v639_v34 = vadd.f32 %v1000_v33, %v877_v28  ;;  %v633_v35 = vpop.f32.mrb[19].mxu0 }
 0x254   : > { %v634_v36 = vadd.f32 %v877_v28, %v633_v35 }
 0x255   : > { %705 = vst [vmem:[%s1693_s24 + $0x18] sm:$0xff] %v639_v34 }
 0x256   : > { %704 = vst [vmem:[%s1693_s24 + $0x10] sm:$0xff] %v634_v36  ;;  %v1003_v37 = vpop.f32.mrb[20].mxu0 }
 0x257   : > { %v649_v38 = vadd.f32 %v1003_v37, %v877_v28  ;;  %v643_v39 = vpop.f32.mrb[21].mxu0 }
 0x258   : > { %v644_v40 = vadd.f32 %v877_v28, %v643_v39 }
 0x259   : > { %707 = vst [vmem:[%s1693_s24 + $0x28] sm:$0xff] %v649_v38 }
 0x25a   : > { %706 = vst [vmem:[%s1693_s24 + $0x20] sm:$0xff] %v644_v40  ;;  %v1006_v41 = vpop.f32.mrb[0].mxu1 }
 0x25b   : > { %v659_v42 = vadd.f32 %v1006_v41, %v877_v28  ;;  %v653_v43 = vpop.f32.mrb[1].mxu1 }
 0x25c   : > { %v654_v44 = vadd.f32 %v877_v28, %v653_v43 }
 0x25d   : > { %709 = vst [vmem:[%s1693_s24 + $0x38] sm:$0xff] %v659_v42 }
 0x25e   : > { %708 = vst [vmem:[%s1693_s24 + $0x30] sm:$0xff] %v654_v44  ;;  %v1009_v45 = vpop.f32.mrb[2].mxu1 }
 0x25f   : > { %v669_v46 = vadd.f32 %v1009_v45, %v877_v28  ;;  %v663_v47 = vpop.f32.mrb[3].mxu1 }
 0x260   : > { %v664_v48 = vadd.f32 %v877_v28, %v663_v47 }
 0x261   : > { %711 = vst [vmem:[%s1693_s24 + $0x48] sm:$0xff] %v669_v46 }
 0x262   : > { %710 = vst [vmem:[%s1693_s24 + $0x40] sm:$0xff] %v664_v48  ;;  %v1012_v49 = vpop.f32.mrb[4].mxu1 }
 0x263   : > { %v679_v50 = vadd.f32 %v1012_v49, %v877_v28  ;;  %v673_v51 = vpop.f32.mrb[5].mxu1 }
 0x264   : > { %v674_v52 = vadd.f32 %v877_v28, %v673_v51 }
 0x265   : > { %713 = vst [vmem:[%s1693_s24 + $0x58] sm:$0xff] %v679_v50 }
 0x266   : > { %712 = vst [vmem:[%s1693_s24 + $0x50] sm:$0xff] %v674_v52  ;;  %v1015_v53 = vpop.f32.mrb[6].mxu1 }
 0x267   : > { %v689_v54 = vadd.f32 %v1015_v53, %v877_v28  ;;  %v683_v55 = vpop.f32.mrb[7].mxu1 }
 0x268   : > { %v684_v56 = vadd.f32 %v877_v28, %v683_v55 }
 0x269   : > { %715 = vst [vmem:[%s1693_s24 + $0x68] sm:$0xff] %v689_v54 }
 0x26a   : > { %714 = vst [vmem:[%s1693_s24 + $0x60] sm:$0xff] %v684_v56  ;;  %v1018_v57 = vpop.f32.mrb[8].mxu1 }
 0x26b   : > { %v699_v58 = vadd.f32 %v1018_v57, %v877_v28  ;;  %v693_v59 = vpop.f32.mrb[9].mxu1 }
 0x26c   : > { %v694_v60 = vadd.f32 %v877_v28, %v693_v59 }
 0x26d   : > { %717 = vst [vmem:[%s1693_s24 + $0x78] sm:$0xff] %v699_v58 }
 0x26e   : > { %716 = vst [vmem:[%s1693_s24 + $0x70] sm:$0xff] %v694_v60 }
 0x26f   : > { %1317 = shalt.err (!%p1314_p12)
}
 0x270   : > { %s1318_s29 = scalar_lea.hbm %s1714_s6, 2048  ;;  %s1322_s13 = scalar_lea.hbm %s1766_s5, 8192 }
 0x271   : > { %p1319_p9 = scmp.ne.s32.totalorder %s1714_s6, %s1318_s29  ;;  %p1323_p6 = scmp.lt.u32.totalorder %s1714_s6, %s1766_s5 }
 0x272   : > { %p1324_p4 = scmp.lt.u32.totalorder %s1322_s13, %s1318_s29  ;;  %p1326_p3 = scmp.lt.u32.totalorder %s1318_s29, %s1714_s6 }
 0x273   : > { %p1320_p13 = pnand %p1319_p9, %p1584_p0 }
 0x274   : > { %p1325_p8 = por %p1324_p4, %p1323_p6 }
 0x275   : > { %p1321_p10 = pneg %p1320_p13 }
 0x276   : > { %p1327_p5 = por %p1326_p3, %p1325_p8 }
 0x278   : > { %p1328_p7 = pnand %p1327_p5, %p1321_p10 }
 0x27a   : > { %1331 = shalt.err (!%p1328_p7)
}
 0x27b   : > { %s1388_s26 = smov 128   ;;  %s1389_s27 = smov 8  }
 0x27c   : > { %1089 = dma.vmem_to_hbm [thread:$0]  (%p1584_p0), %s1716_s23, 2048, %s1714_s6, %s719_s22, %s1388_s26, %s1388_s26, %s1389_s27  }
 0x27d PF: > { %p1121_p11 = scmp.ge.s32.totalorder %s1378_s21, 2  ;;  %s747_s16 = sand.u32 1, %s1366_s18  }
 0x27e   : > { %p1784_p1 = scmp.ne.s32.totalorder %s1771_s25, 0  ;;  %s748_s17 = scalar_lea.sflag [#allocation4], %s747_s16 }
 0x280   : > { %p1109_p2 = pnand %p1121_p11, %p1784_p1 }
 0x282   : > { %1361 = dma.done.wait (!%p1109_p2), %s748_s17, 2048  }
 0x283   : > { %1363 = vsyncadd (!%p1109_p2), %s748_s17, 4294965248  ;;  %p20_p12 = scmp.ge.s32.totalorder %s1574_s14, 6   ;;  %s1785_s18 = smov %s1370_s19 }
 0x284   : > { %s1786_s19 = smov %s1374_s20  ;;  %s1787_s20 = smov %s1590_s10 }
 0x285   : > { %s1788_s21 = smov %s1574_s14  ;;  %22 = sbr.rel (!%p20_p12) target bundleno = 7 (0x7), region = 101 }
 0x28c   :  { %753 = vsyncpa [#allocation3], 1 }
 0x28d   :  { %755 = vsyncpa [#allocation3 + $0x1], 1 }
 0x28e   :  { %756 = vsyncpa [#allocation6], 1 }
 0x28f   :  { %757 = vsyncpa [#allocation9], 1 }
 0x290   :  { %758 = vsyncpa [#allocation4], 1 }
 0x291   :  { %760 = vsyncpa [#allocation4 + $0x1], 1 }

</bundles_post_ra>
